<compile_context>
chip_gen: v7x
topology: tpu7x:2x2x1
jax: 0.10.0
libtpu: 0.0.40
codegen_flags: <defaults>
</compile_context>

<pallas_src>
import functools
import numpy as np
import jax
import jax.numpy as jnp
from jax.experimental import pallas as pl
from jax.experimental.pallas import tpu as pltpu

# ---------------------------------------------------------------------------
# SELU constants (match torch.nn.SELU)
_SELU_SCALE = 1.0507009873554804934193349852946
_SELU_ALPHA = 1.6732632423543772848170429916717


def _selu(x):
    # exp(min(x, 0)) keeps the EUP path finite and cheap; selected away for x>0.
    return _SELU_SCALE * jnp.where(
        x > 0, x, _SELU_ALPHA * (jnp.exp(jnp.minimum(x, 0.0)) - 1.0)
    )


def _round_up(x, m):
    return ((x + m - 1) // m) * m


# ---------------------------------------------------------------------------
# Kernel: one batch tile of the fused actor+critic 4-layer MLPs.
def actor_critic_kernel(
    obs_ref,                                   # [TB, K]        bf16 (native K)
    w1_ref, b1_ref,                            # [K, 2H] bf16,  [1, 2H] f32
    aw2_ref, ab2_ref, cw2_ref, cb2_ref,        # [H, H] bf16,   [1, H] f32
    aw3_ref, ab3_ref, cw3_ref, cb3_ref,        # [H, H] bf16,   [1, H] f32
    w4_ref, b4_ref,                            # [2H, OUT_PAD] bf16, [1, OUT_PAD] f32
    out_ref,                                   # [TB, OUT_PAD]  f32
):
    H = aw2_ref.shape[0]
    x = obs_ref[...]                                                     # bf16

    # Fused layer 1: actor|critic share x -> one wide matmul, then split.
    h = _selu(jnp.dot(x, w1_ref[...], preferred_element_type=jnp.float32)
              + b1_ref[...])                                             # [TB, 2H] f32
    ha = h[:, :H].astype(jnp.bfloat16)
    hc = h[:, H:].astype(jnp.bfloat16)

    # Layer 2
    ha = _selu(jnp.dot(ha, aw2_ref[...], preferred_element_type=jnp.float32)
               + ab2_ref[...])
    hc = _selu(jnp.dot(hc, cw2_ref[...], preferred_element_type=jnp.float32)
               + cb2_ref[...])

    # Layer 3
    ha = _selu(jnp.dot(ha.astype(jnp.bfloat16), aw3_ref[...],
                       preferred_element_type=jnp.float32) + ab3_ref[...])
    hc = _selu(jnp.dot(hc.astype(jnp.bfloat16), cw3_ref[...],
                       preferred_element_type=jnp.float32) + cb3_ref[...])

    # Fused heads: single [TB, 2H] x [2H, OUT_PAD] matmul -> lane-dense output
    # (cols 0:A = actions_mean, col A = value, rest zero-pad).
    hcat = jnp.concatenate(
        [ha.astype(jnp.bfloat16), hc.astype(jnp.bfloat16)], axis=-1)     # [TB, 2H]
    out = (jnp.dot(hcat, w4_ref[...], preferred_element_type=jnp.float32)
           + b4_ref[...])
    out_ref[...] = out.astype(out_ref.dtype)


# ---------------------------------------------------------------------------
# One-time weight packing (call once per rollout / param update, NOT per step).
def make_packed_params(actor_params, critic_params):
    aw1, ab1, aw2, ab2, aw3, ab3, aw4, ab4 = actor_params
    cw1, cb1, cw2, cb2, cw3, cb3, cw4, cb4 = critic_params
    H = aw1.shape[1]            # hidden (256)
    A = aw4.shape[1]            # num actions
    OUT_PAD = _round_up(A + 1, 128)

    bf = lambda a: a.astype(jnp.bfloat16)

    # Fused layer 1 (native K; no feature padding in HBM).
    w1 = jnp.concatenate([aw1, cw1], axis=1)                 # [K, 2H]
    b1 = jnp.concatenate([ab1, cb1], axis=1)                 # [1, 2H]

    # Fused, lane-padded head: rows 0:H actor, rows H:2H critic;
    # cols 0:A = actor mean, col A = value.
    w4 = jnp.zeros((2 * H, OUT_PAD), jnp.float32)
    w4 = w4.at[:H, :A].set(aw4).at[H:, A:A + 1].set(cw4)
    b4 = jnp.zeros((1, OUT_PAD), jnp.float32)
    b4 = b4.at[:, :A].set(ab4).at[:, A:A + 1].set(cb4)

    packed = (
        bf(w1), b1,
        bf(aw2), ab2, bf(cw2), cb2,
        bf(aw3), ab3, bf(cw3), cb3,
        bf(w4), b4,
    )
    return jax.tree_util.tree_map(jax.device_put, packed)


def _choose_tile(B):
    """Adaptive batch tile: minimal pad for small B, >=2 grid steps for v7x,
    512-row tiles for big throughput batches."""
    B1 = max(B, 1)
    if B1 <= 256:
        return _round_up(B1, 8)                      # one step, minimal MXU pad
    if B1 <= 2048:
        return _round_up(-(-B1 // 2), 128)           # 2 steps -> both v7x TCs
    return 512                                        # amortize grid-step cost


def run_actor_critic(obs, packed, num_actions, *, tile_b=None):
    """Returns (actions_mean [B, A], value [B, 1]) from one gridded Pallas call."""
    B, obs_dim = obs.shape
    H = packed[2].shape[0]            # aw2: [H, H]
    OUT_PAD = packed[-2].shape[1]     # w4:  [2H, OUT_PAD]
    A = num_actions

    if tile_b is None:
        tile_b = _choose_tile(B)
    B_pad = _round_up(max(B, 1), tile_b)

    obs_b = obs.astype(jnp.bfloat16)
    if B_pad != B:
        obs_b = jnp.pad(obs_b, ((0, B_pad - B), (0, 0)))

    grid = (B_pad // tile_b,)
    const_map = lambda i: (0, 0)                 # weights: VMEM-resident across steps
    weight_specs = [pl.BlockSpec(w.shape, const_map) for w in packed]

    # Advisory cost estimate.
    flops = int(B_pad * (4 * obs_dim * H + 8 * H * H + 4 * H * OUT_PAD))
    transcendentals = int(B_pad * 6 * H)         # one exp per SELU element
    bytes_weights = sum(int(w.size) * int(w.dtype.itemsize) for w in packed)
    bytes_accessed = int(bytes_weights + B_pad * obs_dim * 2 + B_pad * OUT_PAD * 4)

    out = pl.pallas_call(
        actor_critic_kernel,
        out_shape=jax.ShapeDtypeStruct((B_pad, OUT_PAD), jnp.float32),
        grid_spec=pltpu.PrefetchScalarGridSpec(
            num_scalar_prefetch=0,
            grid=grid,
            in_specs=[pl.BlockSpec((tile_b, obs_dim), lambda i: (i, 0))]
                     + weight_specs,
            out_specs=pl.BlockSpec((tile_b, OUT_PAD), lambda i: (i, 0)),
        ),
        compiler_params=pltpu.CompilerParams(
            dimension_semantics=("parallel",)),
        cost_estimate=pl.CostEstimate(
            flops=flops, transcendentals=transcendentals,
            bytes_accessed=bytes_accessed),
    )(obs_b, *packed)

    actions_mean = out[:B, :A]
    value = out[:B, A:A + 1]
    return actions_mean, value


# ---------------------------------------------------------------------------
# ActorCriticPC.act() semantics (distribution glue in plain JAX), fully jitted
# so the obs cast/pad and the output slicing fuse around the Pallas call.
@jax.jit
def act(obs, packed, log_std, sample_key):
    A = log_std.shape[0]
    actions_mean, value = run_actor_critic(obs, packed, num_actions=A)

    # self.log_std.data = torch.clamp(self.log_std.data, -20, 20)
    log_std = jnp.clip(log_std, -20.0, 20.0)
    std = jnp.exp(log_std)
    # NOTE: the original code passes the covariance (std*std) as scale_tril —
    # faithfully reproduced: effective scale = std**2.
    scale = std * std                                          # [A]

    B = actions_mean.shape[0]
    eps = jax.random.normal(sample_key, (B, A), jnp.float32)
    actions = actions_mean + eps * scale[None, :]

    # MultivariateNormal(mean, scale_tril=diag(scale)).log_prob(actions)
    z = (actions - actions_mean) / scale[None, :]
    log_det = jnp.sum(jnp.log(scale))
    actions_log_prob = (
        -0.5 * jnp.sum(z * z, axis=-1)
        - log_det
        - 0.5 * A * jnp.log(2.0 * jnp.pi)
    )

    log_std_rep = jnp.broadcast_to(log_std[None, :], (B, A))
    others = {}
    return actions, actions_log_prob, value, actions_mean, log_std_rep, others


# ---------------------------------------------------------------------------
# Parameter construction (deterministic; mimics nn.Linear default init).
def _linear_init(key, fan_in, fan_out):
    kw, kb = jax.random.split(key)
    bound = 1.0 / np.sqrt(fan_in)
    w = jax.random.uniform(kw, (fan_in, fan_out), jnp.float32, -bound, bound)
    b = jax.random.uniform(kb, (1, fan_out), jnp.float32, -bound, bound)
    return w, b


def make_mlp_params(key, in_dim, hidden, out_dim):
    dims = [in_dim] + list(hidden) + [out_dim]
    params = []
    for i in range(len(dims) - 1):
        key, sub = jax.random.split(key)
        w, b = _linear_init(sub, dims[i], dims[i + 1])
        params.extend([w, b])
    return tuple(params)


# ---------------------------------------------------------------------------
# Pure-JAX reference with the same bf16-matmul / f32-accumulate policy.
def _ref_mlp(x, params):
    w1, b1, w2, b2, w3, b3, w4, b4 = params
    bf = jnp.bfloat16
    h = _selu(jnp.dot(x.astype(bf), w1.astype(bf),
                      preferred_element_type=jnp.float32) + b1)
    h = _selu(jnp.dot(h.astype(bf), w2.astype(bf),
                      preferred_element_type=jnp.float32) + b2)
    h = _selu(jnp.dot(h.astype(bf), w3.astype(bf),
                      preferred_element_type=jnp.float32) + b3)
    return jnp.dot(h.astype(bf), w4.astype(bf),
                   preferred_element_type=jnp.float32) + b4


# ---------------------------------------------------------------------------
if __name__ == "__main__":
    # Small shapes consistent with the module: obs_shape=(32,), actions_shape=(8,)
    B, OBS_DIM, ACT_DIM = 8, 32, 8
    HIDDEN = [256, 256, 256]       # model_cfg=None defaults
    INITIAL_STD = 0.8

    root = jax.random.PRNGKey(0)
    k_obs, k_actor, k_critic, k_sample = jax.random.split(root, 4)

    obs = jax.random.normal(k_obs, (B, OBS_DIM), jnp.float32)
    actor_params = make_mlp_params(k_actor, OBS_DIM, HIDDEN, ACT_DIM)
    critic_params = make_mlp_params(k_critic, OBS_DIM, HIDDEN, 1)
    log_std = jnp.full((ACT_DIM,), np.log(INITIAL_STD), jnp.float32)

    # Pack weights ONCE (hoisted out of the per-step path).
    packed = make_packed_params(actor_params, critic_params)

    outs = act(obs, packed, log_std, k_sample)
    outs = jax.block_until_ready(outs)

    actions, actions_log_prob, value, actions_mean, log_std_rep, _ = outs
    assert actions.shape == (B, ACT_DIM)
    assert actions_log_prob.shape == (B,)
    assert value.shape == (B, 1)
    assert actions_mean.shape == (B, ACT_DIM)
    assert log_std_rep.shape == (B, ACT_DIM)
    assert all(bool(jnp.all(jnp.isfinite(o))) for o in
               (actions, actions_log_prob, value, actions_mean, log_std_rep))

    # Numerical check against a pure-JAX reference with the same mixed precision.
    ref_mean = _ref_mlp(obs, actor_params)
    ref_value = _ref_mlp(obs, critic_params)
    np.testing.assert_allclose(np.asarray(actions_mean), np.asarray(ref_mean),
                               rtol=1e-2, atol=1e-2)
    np.testing.assert_allclose(np.asarray(value), np.asarray(ref_value),
                               rtol=1e-2, atol=1e-2)

    # Also exercise a larger batch so the multi-step (pipelined / megacore) grid
    # path is compiled and checked.
    B2 = 600
    obs2 = jax.random.normal(jax.random.PRNGKey(1), (B2, OBS_DIM), jnp.float32)
    mean2, val2 = jax.block_until_ready(
        jax.jit(lambda o: run_actor_critic(o, packed, ACT_DIM))(obs2))
    np.testing.assert_allclose(np.asarray(mean2), np.asarray(_ref_mlp(obs2, actor_params)),
                               rtol=1e-2, atol=1e-2)
    np.testing.assert_allclose(np.asarray(val2), np.asarray(_ref_mlp(obs2, critic_params)),
                               rtol=1e-2, atol=1e-2)

    # TODO(synk): inference_bbox/get_features (point-cloud backbone + pose
    # estimation) have no Pallas equivalent and are unused since feature_dim=0.
    print("KERNEL_OK")
</pallas_src>

<mosaic_0001>
module attributes {stable_mosaic.version = 11 : i64} {
  func.func @actor_critic_kernel(%arg0: i32, %arg1: memref<8x32xbf16, #tpu.memory_space<vmem>>, %arg2: memref<32x512xbf16, #tpu.memory_space<vmem>>, %arg3: memref<1x512xf32, #tpu.memory_space<vmem>>, %arg4: memref<256x256xbf16, #tpu.memory_space<vmem>>, %arg5: memref<1x256xf32, #tpu.memory_space<vmem>>, %arg6: memref<256x256xbf16, #tpu.memory_space<vmem>>, %arg7: memref<1x256xf32, #tpu.memory_space<vmem>>, %arg8: memref<256x256xbf16, #tpu.memory_space<vmem>>, %arg9: memref<1x256xf32, #tpu.memory_space<vmem>>, %arg10: memref<256x256xbf16, #tpu.memory_space<vmem>>, %arg11: memref<1x256xf32, #tpu.memory_space<vmem>>, %arg12: memref<512x128xbf16, #tpu.memory_space<vmem>>, %arg13: memref<1x128xf32, #tpu.memory_space<vmem>>, %arg14: memref<8x128xf32, #tpu.memory_space<vmem>>) attributes {dimension_semantics = [#tpu.dimension_semantics<parallel>], iteration_bounds = array<i64: 1>, scalar_prefetch = 0 : i64, scratch_operands = 0 : i64, tpu.core_type = #tpu.core_type<tc>, window_params = [{transform_indices = @transform_0, window_bounds = array<i64: 8, 32>}, {pipeline_mode = #tpu.pipeline_mode<synchronous>, transform_indices = @transform_1, window_bounds = array<i64: 32, 512>}, {pipeline_mode = #tpu.pipeline_mode<synchronous>, transform_indices = @transform_2, window_bounds = array<i64: 1, 512>}, {pipeline_mode = #tpu.pipeline_mode<synchronous>, transform_indices = @transform_3, window_bounds = array<i64: 256, 256>}, {pipeline_mode = #tpu.pipeline_mode<synchronous>, transform_indices = @transform_4, window_bounds = array<i64: 1, 256>}, {pipeline_mode = #tpu.pipeline_mode<synchronous>, transform_indices = @transform_5, window_bounds = array<i64: 256, 256>}, {pipeline_mode = #tpu.pipeline_mode<synchronous>, transform_indices = @transform_6, window_bounds = array<i64: 1, 256>}, {pipeline_mode = #tpu.pipeline_mode<synchronous>, transform_indices = @transform_7, window_bounds = array<i64: 256, 256>}, {pipeline_mode = #tpu.pipeline_mode<synchronous>, transform_indices = @transform_8, window_bounds = array<i64: 1, 256>}, {pipeline_mode = #tpu.pipeline_mode<synchronous>, transform_indices = @transform_9, window_bounds = array<i64: 256, 256>}, {pipeline_mode = #tpu.pipeline_mode<synchronous>, transform_indices = @transform_10, window_bounds = array<i64: 1, 256>}, {pipeline_mode = #tpu.pipeline_mode<synchronous>, transform_indices = @transform_11, window_bounds = array<i64: 512, 128>}, {pipeline_mode = #tpu.pipeline_mode<synchronous>, transform_indices = @transform_12, window_bounds = array<i64: 1, 128>}, {transform_indices = @transform_13, window_bounds = array<i64: 8, 128>}]} {
    %c0 = arith.constant 0 : index
    %c0_0 = arith.constant 0 : index
    %0 = vector.load %arg1[%c0, %c0_0] : memref<8x32xbf16, #tpu.memory_space<vmem>>, vector<8x32xbf16>
    %c0_1 = arith.constant 0 : index
    %c0_2 = arith.constant 0 : index
    %1 = vector.load %arg2[%c0_1, %c0_2] : memref<32x512xbf16, #tpu.memory_space<vmem>>, vector<32x512xbf16>
    %cst = arith.constant dense<0.000000e+00> : vector<8x512xf32>
    %2 = tpu.matmul %0, %1, %cst {dimension_numbers = #tpu.dot_dimension_numbers<[1], [0], [0], [1], [0, 0, 1, 1], [], []>} : vector<8x32xbf16>, vector<32x512xbf16>, vector<8x512xf32> -> vector<8x512xf32>
    %c0_3 = arith.constant 0 : index
    %c0_4 = arith.constant 0 : index
    %3 = vector.load %arg3[%c0_3, %c0_4] : memref<1x512xf32, #tpu.memory_space<vmem>>, vector<1x512xf32>
    %4 = vector.broadcast %3 : vector<1x512xf32> to vector<8x512xf32>
    %5 = arith.addf %2, %4 : vector<8x512xf32>
    %cst_5 = arith.constant 0.000000e+00 : f32
    %6 = vector.broadcast %cst_5 : f32 to vector<8x512xf32>
    %7 = arith.cmpf ogt, %5, %6 : vector<8x512xf32>
    %cst_6 = arith.constant 0.000000e+00 : f32
    %8 = vector.broadcast %cst_6 : f32 to vector<8x512xf32>
    %9 = arith.minimumf %5, %8 : vector<8x512xf32>
    %10 = math.exp %9 : vector<8x512xf32>
    %cst_7 = arith.constant 1.000000e+00 : f32
    %11 = vector.broadcast %cst_7 : f32 to vector<8x512xf32>
    %12 = arith.subf %10, %11 : vector<8x512xf32>
    %cst_8 = arith.constant 1.67326319 : f32
    %13 = vector.broadcast %cst_8 : f32 to vector<8x512xf32>
    %14 = arith.mulf %13, %12 : vector<8x512xf32>
    %15 = arith.select %7, %5, %14 : vector<8x512xi1>, vector<8x512xf32>
    %cst_9 = arith.constant 1.05070102 : f32
    %16 = vector.broadcast %cst_9 : f32 to vector<8x512xf32>
    %17 = arith.mulf %16, %15 : vector<8x512xf32>
    %18 = vector.extract_strided_slice %17 {offsets = [0, 0], sizes = [8, 256], strides = [1, 1]} : vector<8x512xf32> to vector<8x256xf32>
    %19 = arith.truncf %18 : vector<8x256xf32> to vector<8x256xbf16>
    %20 = vector.extract_strided_slice %17 {offsets = [0, 256], sizes = [8, 256], strides = [1, 1]} : vector<8x512xf32> to vector<8x256xf32>
    %21 = arith.truncf %20 : vector<8x256xf32> to vector<8x256xbf16>
    %c0_10 = arith.constant 0 : index
    %c0_11 = arith.constant 0 : index
    %22 = vector.load %arg4[%c0_10, %c0_11] : memref<256x256xbf16, #tpu.memory_space<vmem>>, vector<256x256xbf16>
    %cst_12 = arith.constant dense<0.000000e+00> : vector<8x256xf32>
    %23 = tpu.matmul %19, %22, %cst_12 {dimension_numbers = #tpu.dot_dimension_numbers<[1], [0], [0], [1], [0, 0, 1, 1], [], []>} : vector<8x256xbf16>, vector<256x256xbf16>, vector<8x256xf32> -> vector<8x256xf32>
    %c0_13 = arith.constant 0 : index
    %c0_14 = arith.constant 0 : index
    %24 = vector.load %arg5[%c0_13, %c0_14] : memref<1x256xf32, #tpu.memory_space<vmem>>, vector<1x256xf32>
    %25 = vector.broadcast %24 : vector<1x256xf32> to vector<8x256xf32>
    %26 = arith.addf %23, %25 : vector<8x256xf32>
    %cst_15 = arith.constant 0.000000e+00 : f32
    %27 = vector.broadcast %cst_15 : f32 to vector<8x256xf32>
    %28 = arith.cmpf ogt, %26, %27 : vector<8x256xf32>
    %cst_16 = arith.constant 0.000000e+00 : f32
    %29 = vector.broadcast %cst_16 : f32 to vector<8x256xf32>
    %30 = arith.minimumf %26, %29 : vector<8x256xf32>
    %31 = math.exp %30 : vector<8x256xf32>
    %cst_17 = arith.constant 1.000000e+00 : f32
    %32 = vector.broadcast %cst_17 : f32 to vector<8x256xf32>
    %33 = arith.subf %31, %32 : vector<8x256xf32>
    %cst_18 = arith.constant 1.67326319 : f32
    %34 = vector.broadcast %cst_18 : f32 to vector<8x256xf32>
    %35 = arith.mulf %34, %33 : vector<8x256xf32>
    %36 = arith.select %28, %26, %35 : vector<8x256xi1>, vector<8x256xf32>
    %cst_19 = arith.constant 1.05070102 : f32
    %37 = vector.broadcast %cst_19 : f32 to vector<8x256xf32>
    %38 = arith.mulf %37, %36 : vector<8x256xf32>
    %c0_20 = arith.constant 0 : index
    %c0_21 = arith.constant 0 : index
    %39 = vector.load %arg6[%c0_20, %c0_21] : memref<256x256xbf16, #tpu.memory_space<vmem>>, vector<256x256xbf16>
    %cst_22 = arith.constant dense<0.000000e+00> : vector<8x256xf32>
    %40 = tpu.matmul %21, %39, %cst_22 {dimension_numbers = #tpu.dot_dimension_numbers<[1], [0], [0], [1], [0, 0, 1, 1], [], []>} : vector<8x256xbf16>, vector<256x256xbf16>, vector<8x256xf32> -> vector<8x256xf32>
    %c0_23 = arith.constant 0 : index
    %c0_24 = arith.constant 0 : index
    %41 = vector.load %arg7[%c0_23, %c0_24] : memref<1x256xf32, #tpu.memory_space<vmem>>, vector<1x256xf32>
    %42 = vector.broadcast %41 : vector<1x256xf32> to vector<8x256xf32>
    %43 = arith.addf %40, %42 : vector<8x256xf32>
    %cst_25 = arith.constant 0.000000e+00 : f32
    %44 = vector.broadcast %cst_25 : f32 to vector<8x256xf32>
    %45 = arith.cmpf ogt, %43, %44 : vector<8x256xf32>
    %cst_26 = arith.constant 0.000000e+00 : f32
    %46 = vector.broadcast %cst_26 : f32 to vector<8x256xf32>
    %47 = arith.minimumf %43, %46 : vector<8x256xf32>
    %48 = math.exp %47 : vector<8x256xf32>
    %cst_27 = arith.constant 1.000000e+00 : f32
    %49 = vector.broadcast %cst_27 : f32 to vector<8x256xf32>
    %50 = arith.subf %48, %49 : vector<8x256xf32>
    %cst_28 = arith.constant 1.67326319 : f32
    %51 = vector.broadcast %cst_28 : f32 to vector<8x256xf32>
    %52 = arith.mulf %51, %50 : vector<8x256xf32>
    %53 = arith.select %45, %43, %52 : vector<8x256xi1>, vector<8x256xf32>
    %cst_29 = arith.constant 1.05070102 : f32
    %54 = vector.broadcast %cst_29 : f32 to vector<8x256xf32>
    %55 = arith.mulf %54, %53 : vector<8x256xf32>
    %56 = arith.truncf %38 : vector<8x256xf32> to vector<8x256xbf16>
    %c0_30 = arith.constant 0 : index
    %c0_31 = arith.constant 0 : index
    %57 = vector.load %arg8[%c0_30, %c0_31] : memref<256x256xbf16, #tpu.memory_space<vmem>>, vector<256x256xbf16>
    %cst_32 = arith.constant dense<0.000000e+00> : vector<8x256xf32>
    %58 = tpu.matmul %56, %57, %cst_32 {dimension_numbers = #tpu.dot_dimension_numbers<[1], [0], [0], [1], [0, 0, 1, 1], [], []>} : vector<8x256xbf16>, vector<256x256xbf16>, vector<8x256xf32> -> vector<8x256xf32>
    %c0_33 = arith.constant 0 : index
    %c0_34 = arith.constant 0 : index
    %59 = vector.load %arg9[%c0_33, %c0_34] : memref<1x256xf32, #tpu.memory_space<vmem>>, vector<1x256xf32>
    %60 = vector.broadcast %59 : vector<1x256xf32> to vector<8x256xf32>
    %61 = arith.addf %58, %60 : vector<8x256xf32>
    %cst_35 = arith.constant 0.000000e+00 : f32
    %62 = vector.broadcast %cst_35 : f32 to vector<8x256xf32>
    %63 = arith.cmpf ogt, %61, %62 : vector<8x256xf32>
    %cst_36 = arith.constant 0.000000e+00 : f32
    %64 = vector.broadcast %cst_36 : f32 to vector<8x256xf32>
    %65 = arith.minimumf %61, %64 : vector<8x256xf32>
    %66 = math.exp %65 : vector<8x256xf32>
    %cst_37 = arith.constant 1.000000e+00 : f32
    %67 = vector.broadcast %cst_37 : f32 to vector<8x256xf32>
    %68 = arith.subf %66, %67 : vector<8x256xf32>
    %cst_38 = arith.constant 1.67326319 : f32
    %69 = vector.broadcast %cst_38 : f32 to vector<8x256xf32>
    %70 = arith.mulf %69, %68 : vector<8x256xf32>
    %71 = arith.select %63, %61, %70 : vector<8x256xi1>, vector<8x256xf32>
    %cst_39 = arith.constant 1.05070102 : f32
    %72 = vector.broadcast %cst_39 : f32 to vector<8x256xf32>
    %73 = arith.mulf %72, %71 : vector<8x256xf32>
    %74 = arith.truncf %55 : vector<8x256xf32> to vector<8x256xbf16>
    %c0_40 = arith.constant 0 : index
    %c0_41 = arith.constant 0 : index
    %75 = vector.load %arg10[%c0_40, %c0_41] : memref<256x256xbf16, #tpu.memory_space<vmem>>, vector<256x256xbf16>
    %cst_42 = arith.constant dense<0.000000e+00> : vector<8x256xf32>
    %76 = tpu.matmul %74, %75, %cst_42 {dimension_numbers = #tpu.dot_dimension_numbers<[1], [0], [0], [1], [0, 0, 1, 1], [], []>} : vector<8x256xbf16>, vector<256x256xbf16>, vector<8x256xf32> -> vector<8x256xf32>
    %c0_43 = arith.constant 0 : index
    %c0_44 = arith.constant 0 : index
    %77 = vector.load %arg11[%c0_43, %c0_44] : memref<1x256xf32, #tpu.memory_space<vmem>>, vector<1x256xf32>
    %78 = vector.broadcast %77 : vector<1x256xf32> to vector<8x256xf32>
    %79 = arith.addf %76, %78 : vector<8x256xf32>
    %cst_45 = arith.constant 0.000000e+00 : f32
    %80 = vector.broadcast %cst_45 : f32 to vector<8x256xf32>
    %81 = arith.cmpf ogt, %79, %80 : vector<8x256xf32>
    %cst_46 = arith.constant 0.000000e+00 : f32
    %82 = vector.broadcast %cst_46 : f32 to vector<8x256xf32>
    %83 = arith.minimumf %79, %82 : vector<8x256xf32>
    %84 = math.exp %83 : vector<8x256xf32>
    %cst_47 = arith.constant 1.000000e+00 : f32
    %85 = vector.broadcast %cst_47 : f32 to vector<8x256xf32>
    %86 = arith.subf %84, %85 : vector<8x256xf32>
    %cst_48 = arith.constant 1.67326319 : f32
    %87 = vector.broadcast %cst_48 : f32 to vector<8x256xf32>
    %88 = arith.mulf %87, %86 : vector<8x256xf32>
    %89 = arith.select %81, %79, %88 : vector<8x256xi1>, vector<8x256xf32>
    %cst_49 = arith.constant 1.05070102 : f32
    %90 = vector.broadcast %cst_49 : f32 to vector<8x256xf32>
    %91 = arith.mulf %90, %89 : vector<8x256xf32>
    %92 = arith.truncf %73 : vector<8x256xf32> to vector<8x256xbf16>
    %93 = arith.truncf %91 : vector<8x256xf32> to vector<8x256xbf16>
    %94 = tpu.concatenate %92, %93 in 1 : vector<8x256xbf16>, vector<8x256xbf16> -> vector<8x512xbf16>
    %c0_50 = arith.constant 0 : index
    %c0_51 = arith.constant 0 : index
    %95 = vector.load %arg12[%c0_50, %c0_51] : memref<512x128xbf16, #tpu.memory_space<vmem>>, vector<512x128xbf16>
    %cst_52 = arith.constant dense<0.000000e+00> : vector<8x128xf32>
    %96 = tpu.matmul %94, %95, %cst_52 {dimension_numbers = #tpu.dot_dimension_numbers<[1], [0], [0], [1], [0, 0, 1, 1], [], []>} : vector<8x512xbf16>, vector<512x128xbf16>, vector<8x128xf32> -> vector<8x128xf32>
    %c0_53 = arith.constant 0 : index
    %c0_54 = arith.constant 0 : index
    %97 = vector.load %arg13[%c0_53, %c0_54] : memref<1x128xf32, #tpu.memory_space<vmem>>, vector<1x128xf32>
    %98 = vector.broadcast %97 : vector<1x128xf32> to vector<8x128xf32>
    %99 = arith.addf %96, %98 : vector<8x128xf32>
    %c0_55 = arith.constant 0 : index
    %c0_56 = arith.constant 0 : index
    %100 = vector.load %arg14[%c0_55, %c0_56] : memref<8x128xf32, #tpu.memory_space<vmem>>, vector<8x128xf32>
    tpu.vector_store %arg14[%c0_55, %c0_56], %99 {strides = array<i32>} : memref<8x128xf32, #tpu.memory_space<vmem>>, vector<8x128xf32>,
    return
  }
  func.func @transform_0(%arg0: i32) -> (i32, i32) {
    %c0_i32 = arith.constant 0 : i32
    %c0_i32_0 = arith.constant 0 : i32
    return %arg0, %c0_i32 : i32, i32
  }
  func.func @transform_1(%arg0: i32) -> (i32, i32) {
    %c0_i32 = arith.constant 0 : i32
    %c0_i32_0 = arith.constant 0 : i32
    %c0_i32_1 = arith.constant 0 : i32
    return %c0_i32, %c0_i32_0 : i32, i32
  }
  func.func @transform_2(%arg0: i32) -> (i32, i32) {
    %c0_i32 = arith.constant 0 : i32
    %c0_i32_0 = arith.constant 0 : i32
    %c0_i32_1 = arith.constant 0 : i32
    return %c0_i32, %c0_i32_0 : i32, i32
  }
  func.func @transform_3(%arg0: i32) -> (i32, i32) {
    %c0_i32 = arith.constant 0 : i32
    %c0_i32_0 = arith.constant 0 : i32
    %c0_i32_1 = arith.constant 0 : i32
    return %c0_i32, %c0_i32_0 : i32, i32
  }
  func.func @transform_4(%arg0: i32) -> (i32, i32) {
    %c0_i32 = arith.constant 0 : i32
    %c0_i32_0 = arith.constant 0 : i32
    %c0_i32_1 = arith.constant 0 : i32
    return %c0_i32, %c0_i32_0 : i32, i32
  }
  func.func @transform_5(%arg0: i32) -> (i32, i32) {
    %c0_i32 = arith.constant 0 : i32
    %c0_i32_0 = arith.constant 0 : i32
    %c0_i32_1 = arith.constant 0 : i32
    return %c0_i32, %c0_i32_0 : i32, i32
  }
  func.func @transform_6(%arg0: i32) -> (i32, i32) {
    %c0_i32 = arith.constant 0 : i32
    %c0_i32_0 = arith.constant 0 : i32
    %c0_i32_1 = arith.constant 0 : i32
    return %c0_i32, %c0_i32_0 : i32, i32
  }
  func.func @transform_7(%arg0: i32) -> (i32, i32) {
    %c0_i32 = arith.constant 0 : i32
    %c0_i32_0 = arith.constant 0 : i32
    %c0_i32_1 = arith.constant 0 : i32
    return %c0_i32, %c0_i32_0 : i32, i32
  }
  func.func @transform_8(%arg0: i32) -> (i32, i32) {
    %c0_i32 = arith.constant 0 : i32
    %c0_i32_0 = arith.constant 0 : i32
    %c0_i32_1 = arith.constant 0 : i32
    return %c0_i32, %c0_i32_0 : i32, i32
  }
  func.func @transform_9(%arg0: i32) -> (i32, i32) {
    %c0_i32 = arith.constant 0 : i32
    %c0_i32_0 = arith.constant 0 : i32
    %c0_i32_1 = arith.constant 0 : i32
    return %c0_i32, %c0_i32_0 : i32, i32
  }
  func.func @transform_10(%arg0: i32) -> (i32, i32) {
    %c0_i32 = arith.constant 0 : i32
    %c0_i32_0 = arith.constant 0 : i32
    %c0_i32_1 = arith.constant 0 : i32
    return %c0_i32, %c0_i32_0 : i32, i32
  }
  func.func @transform_11(%arg0: i32) -> (i32, i32) {
    %c0_i32 = arith.constant 0 : i32
    %c0_i32_0 = arith.constant 0 : i32
    %c0_i32_1 = arith.constant 0 : i32
    return %c0_i32, %c0_i32_0 : i32, i32
  }
  func.func @transform_12(%arg0: i32) -> (i32, i32) {
    %c0_i32 = arith.constant 0 : i32
    %c0_i32_0 = arith.constant 0 : i32
    %c0_i32_1 = arith.constant 0 : i32
    return %c0_i32, %c0_i32_0 : i32, i32
  }
  func.func @transform_13(%arg0: i32) -> (i32, i32) {
    %c0_i32 = arith.constant 0 : i32
    %c0_i32_0 = arith.constant 0 : i32
    return %arg0, %c0_i32 : i32, i32
  }
}

</mosaic_0001>

<bundles_post_ra>
// kernel: act.1
= control target key start
LH: loop header
LB: loop body
LE: loop exit
PB: predicated region body
PF: predicated region fallthrough
CT: control target
= control target key end

     0   :  { %18 = vsyncpa [#allocation3], 0  ;;  %s2550_s0 = inlined_call_operand.vmem [shape: bf16[8,32], index: 0, kind: input, shape index: {}]   ;;  %s2551_s1 = inlined_call_operand.vmem [shape: bf16[32,512], index: 1, kind: input, shape index: {}]   ;;  %s2552_s2 = inlined_call_operand.vmem [shape: f32[1,512], index: 2, kind: input, shape index: {}]   ;;  %s2553_s3 = inlined_call_operand.hbm [shape: bf16[256,256], index: 3, kind: input, shape index: {}]   ;;  %s2554_s4 = inlined_call_operand.vmem [shape: f32[1,256], index: 4, kind: input, shape index: {}]   ;;  %s2555_s5 = inlined_call_operand.hbm [shape: bf16[256,256], index: 5, kind: input, shape index: {}]   ;;  %s2556_s6 = inlined_call_operand.vmem [shape: f32[1,256], index: 6, kind: input, shape index: {}]   ;;  %s2557_s7 = inlined_call_operand.hbm [shape: bf16[256,256], index: 7, kind: input, shape index: {}]   ;;  %s2558_s8 = inlined_call_operand.vmem [shape: f32[1,256], index: 8, kind: input, shape index: {}]   ;;  %s2559_s9 = inlined_call_operand.hbm [shape: bf16[256,256], index: 9, kind: input, shape index: {}]   ;;  %s2560_s10 = inlined_call_operand.vmem [shape: f32[1,256], index: 10, kind: input, shape index: {}]   ;;  %s2561_s11 = inlined_call_operand.hbm [shape: bf16[512,128], index: 11, kind: input, shape index: {}]   ;;  %s2562_s12 = inlined_call_operand.vmem [shape: f32[1,128], index: 12, kind: input, shape index: {}]   ;;  %s2563_s13 = inlined_call_operand.vmem [shape: f32[8,128], index: 13, kind: output, shape index: {}]  }
   0x1   :  { %19 = vsyncpa [#allocation5], 0 }
   0x2   :  { %20 = vsyncpa [#allocation8], 0  ;;  %s2322_s25 = smov [#allocation4]   ;;  %s2323_s27 = smov [#allocation7]  }
   0x3   :  { %s46_s26 = sshll.u32 %s2322_s25, 4  ;;  %s74_s28 = sshll.u32 %s2323_s27, 4  ;;  %s47_s26 = int_to_ptr.vmem [resolvable:$true] %s46_s26  ;;  %s2402_s28 = int_to_ptr.vmem [resolvable:$true] %s74_s28 }
   0x4   :  { %s2206_s14 = scalar_lea.hbm %s2555_s5, 4096 }
   0x5   :  { %p2207_p0 = scmp.ne.s32.totalorder %s2555_s5, %s2206_s14  ;;  %p2210_p1 = scmp.lt.u32.totalorder %s2206_s14, %s2555_s5 }
   0x7   :  { %p2212_p2 = pnand %p2210_p1, %p2207_p0 }
   0x9   :  { %2215 = shalt.err (!%p2212_p2)
}
   0xa   :  { %s2216_s19 = scalar_lea.vmem %s47_s26, 4096  ;;  %p2221_p4 = scmp.lt.s32.totalorder %s47_s26, %s47_s26 }
   0xb   :  { %p2217_p3 = scmp.ne.s32.totalorder %s47_s26, %s2216_s19  ;;  %p2222_p5 = scmp.lt.s32.totalorder %s2216_s19, %s2216_s19 }
   0xd   :  { %p2223_p6 = por %p2222_p5, %p2221_p4 }
   0xf   :  { %p2224_p7 = pnand %p2223_p6, %p2217_p3 }
  0x11   :  { %2227 = shalt.err (!%p2224_p7)
}
  0x12   :  { %s2324_s20 = smov 128   ;;  %s2325_s21 = smov 8  }
  0x13   :  { %52 = dma.hbm_to_vmem [thread:$0]  %s2555_s5, 4096, %s47_s26, [#allocation5], %s2324_s20, %s2324_s20, %s2325_s21  }
  0x14   :  { %s2228_s27 = scalar_lea.hbm %s2559_s9, 4096 }
  0x15   :  { %p2229_p8 = scmp.ne.s32.totalorder %s2559_s9, %s2228_s27  ;;  %p2232_p9 = scmp.lt.u32.totalorder %s2228_s27, %s2559_s9 }
  0x17   :  { %p2234_p10 = pnand %p2232_p9, %p2229_p8 }
  0x19   :  { %2237 = shalt.err (!%p2234_p10)
}
  0x1a   :  { %s2238_s16 = scalar_lea.vmem %s2402_s28, 4096  ;;  %p2243_p12 = scmp.lt.s32.totalorder %s2402_s28, %s2402_s28 }
  0x1b   :  { %p2239_p11 = scmp.ne.s32.totalorder %s2402_s28, %s2238_s16  ;;  %p2244_p13 = scmp.lt.s32.totalorder %s2238_s16, %s2238_s16 }
  0x1d   :  { %p2245_p0 = por %p2244_p13, %p2243_p12 }
  0x1f   :  { %p2246_p1 = pnand %p2245_p0, %p2239_p11 }
  0x21   :  { %2249 = shalt.err (!%p2246_p1)
}
  0x22   :  { %80 = dma.hbm_to_vmem [thread:$0]  %s2559_s9, 4096, %s2402_s28, [#allocation8], %s2324_s20, %s2324_s20, %s2325_s21  }
  0x23   :  { %s2326_s17 = smov [#allocation2]   ;;  %s2327_s19 = smov [#allocation6]  }
  0x24   :  { %s32_s18 = sshll.u32 %s2326_s17, 4  ;;  %s60_s22 = sshll.u32 %s2327_s19, 4  ;;  %s33_s18 = int_to_ptr.vmem [resolvable:$true] %s32_s18  ;;  %s2439_s22 = int_to_ptr.vmem [resolvable:$true] %s60_s22 }
  0x25   :  { %s2250_s25 = scalar_lea.hbm %s2553_s3, 4096 }
  0x26   :  { %p2251_p2 = scmp.ne.s32.totalorder %s2553_s3, %s2250_s25  ;;  %p2254_p3 = scmp.lt.u32.totalorder %s2250_s25, %s2553_s3 }
  0x28   :  { %p2256_p4 = pnand %p2254_p3, %p2251_p2 }
  0x2a   :  { %2259 = shalt.err (!%p2256_p4)
}
  0x2b   :  { %s2260_s9 = scalar_lea.vmem %s33_s18, 4096  ;;  %p2265_p6 = scmp.lt.s32.totalorder %s33_s18, %s33_s18 }
  0x2c   :  { %p2261_p5 = scmp.ne.s32.totalorder %s33_s18, %s2260_s9  ;;  %p2266_p7 = scmp.lt.s32.totalorder %s2260_s9, %s2260_s9 }
  0x2e   :  { %p2267_p8 = por %p2266_p7, %p2265_p6 }
  0x30   :  { %p2268_p9 = pnand %p2267_p8, %p2261_p5 }
  0x32   :  { %2271 = shalt.err (!%p2268_p9)
}
  0x33   :  { %38 = dma.hbm_to_vmem [thread:$0]  %s2553_s3, 4096, %s33_s18, [#allocation3], %s2324_s20, %s2324_s20, %s2325_s21  }
  0x34   :  { %s2272_s26 = scalar_lea.hbm %s2557_s7, 4096 }
  0x35   :  { %p2273_p10 = scmp.ne.s32.totalorder %s2557_s7, %s2272_s26  ;;  %p2276_p11 = scmp.lt.u32.totalorder %s2272_s26, %s2557_s7 }
  0x37   :  { %p2278_p12 = pnand %p2276_p11, %p2273_p10 }
  0x39   :  { %2281 = shalt.err (!%p2278_p12)
}
  0x3a   :  { %s2282_s25 = scalar_lea.vmem %s2439_s22, 4096  ;;  %p2287_p0 = scmp.lt.s32.totalorder %s2439_s22, %s2439_s22 }
  0x3b   :  { %p2283_p13 = scmp.ne.s32.totalorder %s2439_s22, %s2282_s25  ;;  %p2288_p1 = scmp.lt.s32.totalorder %s2282_s25, %s2282_s25 }
  0x3d   :  { %p2289_p2 = por %p2288_p1, %p2287_p0 }
  0x3f   :  { %p2290_p3 = pnand %p2289_p2, %p2283_p13 }
  0x41   :  { %2293 = shalt.err (!%p2290_p3)
}
  0x42   :  { %66 = dma.hbm_to_vmem [thread:$0]  %s2557_s7, 4096, %s2439_s22, [#allocation5], %s2324_s20, %s2324_s20, %s2325_s21  }
  0x43   :  { %s2328_s27 = smov [#allocation9]   ;;  %s2294_s9 = scalar_lea.hbm %s2561_s11, 4096 }
  0x44   :  { %s88_s29 = sshll.u32 %s2328_s27, 4  ;;  %p2295_p4 = scmp.ne.s32.totalorder %s2561_s11, %s2294_s9  ;;  %s89_s29 = int_to_ptr.vmem [resolvable:$true] %s88_s29 }
  0x45   :  { %p2298_p5 = scmp.lt.u32.totalorder %s2294_s9, %s2561_s11 }
  0x47   :  { %p2300_p6 = pnand %p2298_p5, %p2295_p4 }
  0x49   :  { %2303 = shalt.err (!%p2300_p6)
}
  0x4a   :  { %s2304_s26 = scalar_lea.vmem %s89_s29, 4096  ;;  %p2309_p8 = scmp.lt.s32.totalorder %s89_s29, %s89_s29 }
  0x4b   :  { %p2305_p7 = scmp.ne.s32.totalorder %s89_s29, %s2304_s26  ;;  %p2310_p9 = scmp.lt.s32.totalorder %s2304_s26, %s2304_s26 }
  0x4d   :  { %p2311_p10 = por %p2310_p9, %p2309_p8 }
  0x4f   :  { %p2312_p11 = pnand %p2311_p10, %p2305_p7 }
  0x51   :  { %2315 = shalt.err (!%p2312_p11)
}
  0x52   :  { %s2329_s7 = smov 64   ;;  %s2330_s20 = smov 4  }
  0x53   :  { %94 = dma.hbm_to_vmem [thread:$0]  %s2561_s11, 4096, %s89_s29, [#allocation8], %s2329_s7, %s2329_s7, %s2330_s20  }
  0x54   :  { %2316 = dma.done.wait [#allocation3], 4096  }
  0x55   :  { %2317 = vsyncadd [#allocation3], 4294963200 }
  0x56   :  { %2318 = dma.done.wait [#allocation5], 8192  }
  0x57   :  { %2319 = vsyncadd [#allocation5], 4294959104 }
  0x58   :  { %2320 = dma.done.wait [#allocation8], 8192  }
  0x59   :  { %2321 = vsyncadd [#allocation8], 4294959104  ;;  %v2331_v0 = vmov 0   ;;  %v1946_v1 = vld [vmem:[%s2551_s1 + $0x4] ss:$16 sps:$4 sm:$0xff]   ;;  %vm184_vm0 = vcmask 261120  }
  0x5a   :  { %220 = vmatprep.mubr.bf16.mxu0 %v2331_v0  ;;  %261 = vmatprep.mubr.bf16.mxu1 %v2331_v0  ;;  %v1948_v2 = vld [vmem:[%s2551_s1 + $0xc] ss:$16 sps:$4 sm:$0xff]   ;;  %v1950_v3 = vld [vmem:[%s2551_s1] ss:$16 sps:$4 sm:$0xff]   ;;  %v1951_v4 = vld [vmem:[%s2551_s1 + $0x8] ss:$16 sps:$4 sm:$0xff]  }
  0x5b   :  { %188 = vmatprep.subr.bf16.mxu0 %v1946_v1  ;;  %229 = vmatprep.subr.bf16.mxu1 %v1948_v2  ;;  %v1952_v5 = vld [vmem:[%s2551_s1 + $0x24] ss:$16 sps:$4 sm:$0xff]   ;;  %v1954_v6 = vld [vmem:[%s2551_s1 + $0x2c] ss:$16 sps:$4 sm:$0xff]   ;;  %v1956_v7 = vld [vmem:[%s2551_s1 + $0x20] ss:$16 sps:$4 sm:$0xff]  }
  0x5c   :  { %189 = vmatpush1.bf16.msra.mxu0 %v1950_v3  ;;  %230 = vmatpush1.bf16.msra.mxu1 %v1951_v4  ;;  %v1957_v8 = vld [vmem:[%s2551_s1 + $0x28] ss:$16 sps:$4 sm:$0xff]   ;;  %v113_v9 = vld [vmem:[%s2550_s0] sm:$0xf]  ;;  %v1960_v11 = vld [vmem:[#allocation2 + $0x4] ss:$8 sps:$4 sm:$0xff]  }
  0x5d   :  { %190 = vmatprep.subr.bf16.mxu0 %v1952_v5  ;;  %231 = vmatprep.subr.bf16.mxu1 %v1954_v6  ;;  %v1958_v10 = vld [vmem:[#allocation2] ss:$8 sps:$4 sm:$0xff]   ;;  %v1963_v13 = vld [vmem:[#allocation4 + $0x4] ss:$8 sps:$4 sm:$0xff]   ;;  %v1966_v14 = vld [vmem:[#allocation2 + $0x14] ss:$8 sps:$4 sm:$0xff]  }
  0x5e   :  { %v1961_v12 = vld [vmem:[#allocation4] ss:$8 sps:$4 sm:$0xff]   ;;  %v1969_v15 = vld [vmem:[#allocation4 + $0x14] ss:$8 sps:$4 sm:$0xff]   ;;  %v1964_v16 = vld [vmem:[#allocation2 + $0x10] ss:$8 sps:$4 sm:$0xff]  }
  0x5f   :  { %v1967_v17 = vld [vmem:[#allocation4 + $0x10] ss:$8 sps:$4 sm:$0xff]   ;;  %v1972_v18 = vld [vmem:[#allocation2 + $0x24] ss:$8 sps:$4 sm:$0xff]   ;;  %v1970_v20 = vld [vmem:[#allocation2 + $0x20] ss:$8 sps:$4 sm:$0xff]  }
  0x60   :  { %191 = vmatpush1.bf16.msra.mxu0 %v1956_v7  ;;  %232 = vmatpush1.bf16.msra.mxu1 %v1957_v8  ;;  %v1975_v19 = vld [vmem:[#allocation4 + $0x24] ss:$8 sps:$4 sm:$0xff]   ;;  %v1973_v21 = vld [vmem:[#allocation4 + $0x20] ss:$8 sps:$4 sm:$0xff]   ;;  %v1978_v22 = vld [vmem:[#allocation2 + $0x34] ss:$8 sps:$4 sm:$0xff]  }
  0x61   :  { %510 = vmatprep.subr.bf16.mxu0 %v1960_v11  ;;  %771 = vmatprep.subr.bf16.mxu1 %v1963_v13  ;;  %v1981_v23 = vld [vmem:[#allocation4 + $0x34] ss:$8 sps:$4 sm:$0xff]   ;;  %v1976_v24 = vld [vmem:[#allocation2 + $0x30] ss:$8 sps:$4 sm:$0xff]   ;;  %v1984_v26 = vld [vmem:[#allocation2 + $0x44] ss:$8 sps:$4 sm:$0xff]  }
  0x62   :  { %v1979_v25 = vld [vmem:[#allocation4 + $0x30] ss:$8 sps:$4 sm:$0xff]   ;;  %v1987_v27 = vld [vmem:[#allocation4 + $0x44] ss:$8 sps:$4 sm:$0xff]   ;;  %v1982_v28 = vld [vmem:[#allocation2 + $0x40] ss:$8 sps:$4 sm:$0xff]  }
  0x63   :  { %1717 = vmatmul.mubr.msk.bf16.vlgmr.msra.gmra.mrb[0].mxu0 %vm184_vm0, %v113_v9  ;;  %1718 = vmatmul.mubr.msk.bf16.vlgmr.msra.gmra.mrb[0].mxu1 %vm184_vm0, %v113_v9  ;;  %v1985_v29 = vld [vmem:[#allocation4 + $0x40] ss:$8 sps:$4 sm:$0xff]   ;;  %v1990_v30 = vld [vmem:[#allocation2 + $0x54] ss:$8 sps:$4 sm:$0xff]   ;;  %v1988_v32 = vld [vmem:[#allocation2 + $0x50] ss:$8 sps:$4 sm:$0xff]  }
  0x64   :  { %511 = vmatpush1.bf16.msra.mxu0 %v1958_v10  ;;  %772 = vmatpush1.bf16.msra.mxu1 %v1961_v12  ;;  %v1993_v31 = vld [vmem:[#allocation4 + $0x54] ss:$8 sps:$4 sm:$0xff]   ;;  %v1991_v33 = vld [vmem:[#allocation4 + $0x50] ss:$8 sps:$4 sm:$0xff]   ;;  %v1996_v34 = vld [vmem:[#allocation2 + $0x64] ss:$8 sps:$4 sm:$0xff]   ;;  %v124_v12 = vlaneseq }
  0x65   :  { %512 = vmatprep.subr.bf16.mxu0 %v1966_v14  ;;  %773 = vmatprep.subr.bf16.mxu1 %v1969_v15  ;;  %v1999_v35 = vld [vmem:[#allocation4 + $0x64] ss:$8 sps:$4 sm:$0xff]   ;;  %v1994_v36 = vld [vmem:[#allocation2 + $0x60] ss:$8 sps:$4 sm:$0xff]   ;;  %v2002_v38 = vld [vmem:[#allocation2 + $0x74] ss:$8 sps:$4 sm:$0xff]  }
  0x66   :  { %v1997_v37 = vld [vmem:[#allocation4 + $0x60] ss:$8 sps:$4 sm:$0xff]   ;;  %v2005_v39 = vld [vmem:[#allocation4 + $0x74] ss:$8 sps:$4 sm:$0xff]   ;;  %v2000_v40 = vld [vmem:[#allocation2 + $0x70] ss:$8 sps:$4 sm:$0xff]  }
  0x67   :  { %v2003_v41 = vld [vmem:[#allocation4 + $0x70] ss:$8 sps:$4 sm:$0xff]   ;;  %v2008_v42 = vld [vmem:[#allocation2 + $0x84] ss:$8 sps:$4 sm:$0xff]   ;;  %v2006_v44 = vld [vmem:[#allocation2 + $0x80] ss:$8 sps:$4 sm:$0xff]  }
  0x68   :  { %513 = vmatpush1.bf16.msra.mxu0 %v1964_v16  ;;  %774 = vmatpush1.bf16.msra.mxu1 %v1967_v17  ;;  %v2011_v43 = vld [vmem:[#allocation4 + $0x84] ss:$8 sps:$4 sm:$0xff]   ;;  %v2009_v45 = vld [vmem:[#allocation4 + $0x80] ss:$8 sps:$4 sm:$0xff]   ;;  %v2014_v46 = vld [vmem:[#allocation2 + $0x94] ss:$8 sps:$4 sm:$0xff]  }
  0x69   :  { %514 = vmatprep.subr.bf16.mxu0 %v1972_v18  ;;  %775 = vmatprep.subr.bf16.mxu1 %v1975_v19  ;;  %v2017_v47 = vld [vmem:[#allocation4 + $0x94] ss:$8 sps:$4 sm:$0xff]   ;;  %v2012_v48 = vld [vmem:[#allocation2 + $0x90] ss:$8 sps:$4 sm:$0xff]   ;;  %v2020_v50 = vld [vmem:[#allocation2 + $0xa4] ss:$8 sps:$4 sm:$0xff]  }
  0x6a   :  { %v2015_v49 = vld [vmem:[#allocation4 + $0x90] ss:$8 sps:$4 sm:$0xff]   ;;  %v2023_v51 = vld [vmem:[#allocation4 + $0xa4] ss:$8 sps:$4 sm:$0xff]   ;;  %v2018_v52 = vld [vmem:[#allocation2 + $0xa0] ss:$8 sps:$4 sm:$0xff]  }
  0x6b   :  { %v2021_v53 = vld [vmem:[#allocation4 + $0xa0] ss:$8 sps:$4 sm:$0xff]   ;;  %v2026_v54 = vld [vmem:[#allocation2 + $0xb4] ss:$8 sps:$4 sm:$0xff]   ;;  %v2024_v56 = vld [vmem:[#allocation2 + $0xb0] ss:$8 sps:$4 sm:$0xff]  }
  0x6c   :  { %515 = vmatpush1.bf16.msra.mxu0 %v1970_v20  ;;  %776 = vmatpush1.bf16.msra.mxu1 %v1973_v21  ;;  %v2029_v55 = vld [vmem:[#allocation4 + $0xb4] ss:$8 sps:$4 sm:$0xff]   ;;  %v2027_v57 = vld [vmem:[#allocation4 + $0xb0] ss:$8 sps:$4 sm:$0xff]   ;;  %v2032_v58 = vld [vmem:[#allocation2 + $0xc4] ss:$8 sps:$4 sm:$0xff]  }
  0x6d   :  { %516 = vmatprep.subr.bf16.mxu0 %v1978_v22  ;;  %777 = vmatprep.subr.bf16.mxu1 %v1981_v23  ;;  %v2035_v59 = vld [vmem:[#allocation4 + $0xc4] ss:$8 sps:$4 sm:$0xff]   ;;  %v2030_v60 = vld [vmem:[#allocation2 + $0xc0] ss:$8 sps:$4 sm:$0xff]   ;;  %v2038_v62 = vld [vmem:[#allocation2 + $0xd4] ss:$8 sps:$4 sm:$0xff]  }
  0x6e   :  { %v2033_v61 = vld [vmem:[#allocation4 + $0xc0] ss:$8 sps:$4 sm:$0xff]   ;;  %v2041_v63 = vld [vmem:[#allocation4 + $0xd4] ss:$8 sps:$4 sm:$0xff]   ;;  %v2036_v0 = vld [vmem:[#allocation2 + $0xd0] ss:$8 sps:$4 sm:$0xff]  }
  0x6f   :  { %v2039_v1 = vld [vmem:[#allocation4 + $0xd0] ss:$8 sps:$4 sm:$0xff]   ;;  %v2044_v2 = vld [vmem:[#allocation2 + $0xe4] ss:$8 sps:$4 sm:$0xff]   ;;  %v2042_v4 = vld [vmem:[#allocation2 + $0xe0] ss:$8 sps:$4 sm:$0xff]  }
  0x70   :  { %517 = vmatpush1.bf16.msra.mxu0 %v1976_v24  ;;  %778 = vmatpush1.bf16.msra.mxu1 %v1979_v25  ;;  %v2047_v3 = vld [vmem:[#allocation4 + $0xe4] ss:$8 sps:$4 sm:$0xff]   ;;  %v2045_v5 = vld [vmem:[#allocation4 + $0xe0] ss:$8 sps:$4 sm:$0xff]   ;;  %v2050_v6 = vld [vmem:[#allocation2 + $0xf4] ss:$8 sps:$4 sm:$0xff]  }
  0x71   :  { %518 = vmatprep.subr.bf16.mxu0 %v1984_v26  ;;  %779 = vmatprep.subr.bf16.mxu1 %v1987_v27  ;;  %v2053_v7 = vld [vmem:[#allocation4 + $0xf4] ss:$8 sps:$4 sm:$0xff]   ;;  %v2048_v8 = vld [vmem:[#allocation2 + $0xf0] ss:$8 sps:$4 sm:$0xff]   ;;  %v2056_v10 = vld [vmem:[#allocation6 + $0x4] ss:$8 sps:$4 sm:$0xff]  }
  0x72   :  { %v2051_v9 = vld [vmem:[#allocation4 + $0xf0] ss:$8 sps:$4 sm:$0xff]   ;;  %v2059_v11 = vld [vmem:[#allocation7 + $0x4] ss:$8 sps:$4 sm:$0xff]   ;;  %v125_v13 = vshrl.u32 %v124_v12, 7 }
  0x73   :  { %v122_v16 = vld [vmem:[%s2552_s2] sm:$0xf] }
  0x74   :  { %519 = vmatpush1.bf16.msra.mxu0 %v1982_v28  ;;  %780 = vmatpush1.bf16.msra.mxu1 %v1985_v29  ;;  %v2515_v14 = vsub.s32 0, %v125_v13  ;;  %v134_v15 = vsub.s32 2, %v125_v13  ;;  %v2520_v17 = vsub.s32 1, %v125_v13  ;;  %v138_v18 = vsub.s32 3, %v125_v13  ;;  %v2069_v12 = vld [vmem:[#allocation7 + $0x20] ss:$8 sps:$4 sm:$0xff]  }
  0x75   :  { %520 = vmatprep.subr.bf16.mxu0 %v1990_v30  ;;  %781 = vmatprep.subr.bf16.mxu1 %v1993_v31  ;;  %v2074_v13 = vld [vmem:[#allocation6 + $0x34] ss:$8 sps:$4 sm:$0xff]  }
  0x76   :  { %v127_v19 = vrot.slane %v122_v16, %v2515_v14  ;;  %v135_v20 = vrot.slane %v122_v16, %v134_v15  ;;  %v131_v21 = vrot.slane %v122_v16, %v2520_v17  ;;  %v139_v22 = vrot.slane %v122_v16, %v138_v18  ;;  %v2077_v15 = vld [vmem:[#allocation7 + $0x34] ss:$8 sps:$4 sm:$0xff]   ;;  %v2072_v16 = vld [vmem:[#allocation6 + $0x30] ss:$8 sps:$4 sm:$0xff]  }
  0x77   :  { %v2075_v18 = vld [vmem:[#allocation7 + $0x30] ss:$8 sps:$4 sm:$0xff]  }
  0x78   :  { %521 = vmatpush1.bf16.msra.mxu0 %v1988_v32  ;;  %782 = vmatpush1.bf16.msra.mxu1 %v1991_v33 }
  0x79   :  { %522 = vmatprep.subr.bf16.mxu0 %v1996_v34  ;;  %783 = vmatprep.subr.bf16.mxu1 %v1999_v35 }
  0x7c   :  { %523 = vmatpush1.bf16.msra.mxu0 %v1994_v36  ;;  %784 = vmatpush1.bf16.msra.mxu1 %v1997_v37 }
  0x7d   :  { %524 = vmatprep.subr.bf16.mxu0 %v2002_v38  ;;  %785 = vmatprep.subr.bf16.mxu1 %v2005_v39 }
  0x80   :  { %525 = vmatpush1.bf16.msra.mxu0 %v2000_v40  ;;  %786 = vmatpush1.bf16.msra.mxu1 %v2003_v41 }
  0x81   :  { %526 = vmatprep.subr.bf16.mxu0 %v2008_v42  ;;  %787 = vmatprep.subr.bf16.mxu1 %v2011_v43 }
  0x84   :  { %527 = vmatpush1.bf16.msra.mxu0 %v2006_v44  ;;  %788 = vmatpush1.bf16.msra.mxu1 %v2009_v45 }
  0x85   :  { %528 = vmatprep.subr.bf16.mxu0 %v2014_v46  ;;  %789 = vmatprep.subr.bf16.mxu1 %v2017_v47 }
  0x88   :  { %529 = vmatpush1.bf16.msra.mxu0 %v2012_v48  ;;  %790 = vmatpush1.bf16.msra.mxu1 %v2015_v49 }
  0x89   :  { %530 = vmatprep.subr.bf16.mxu0 %v2020_v50  ;;  %791 = vmatprep.subr.bf16.mxu1 %v2023_v51 }
  0x8c   :  { %531 = vmatpush1.bf16.msra.mxu0 %v2018_v52  ;;  %792 = vmatpush1.bf16.msra.mxu1 %v2021_v53 }
  0x8d   :  { %532 = vmatprep.subr.bf16.mxu0 %v2026_v54  ;;  %793 = vmatprep.subr.bf16.mxu1 %v2029_v55 }
  0x90   :  { %533 = vmatpush1.bf16.msra.mxu0 %v2024_v56  ;;  %794 = vmatpush1.bf16.msra.mxu1 %v2027_v57 }
  0x91   :  { %534 = vmatprep.subr.bf16.mxu0 %v2032_v58  ;;  %795 = vmatprep.subr.bf16.mxu1 %v2035_v59 }
  0x94   :  { %535 = vmatpush1.bf16.msra.mxu0 %v2030_v60  ;;  %796 = vmatpush1.bf16.msra.mxu1 %v2033_v61 }
  0x95   :  { %536 = vmatprep.subr.bf16.mxu0 %v2038_v62  ;;  %797 = vmatprep.subr.bf16.mxu1 %v2041_v63 }
  0x98   :  { %537 = vmatpush1.bf16.msra.mxu0 %v2036_v0  ;;  %798 = vmatpush1.bf16.msra.mxu1 %v2039_v1  ;;  %v2054_v0 = vld [vmem:[#allocation6] ss:$8 sps:$4 sm:$0xff]  }
  0x99   :  { %538 = vmatprep.subr.bf16.mxu0 %v2044_v2  ;;  %799 = vmatprep.subr.bf16.mxu1 %v2047_v3  ;;  %v2057_v3 = vld [vmem:[#allocation7] ss:$8 sps:$4 sm:$0xff]  }
  0x9c   :  { %539 = vmatpush1.bf16.msra.mxu0 %v2042_v4  ;;  %800 = vmatpush1.bf16.msra.mxu1 %v2045_v5  ;;  %v2062_v4 = vld [vmem:[#allocation6 + $0x14] ss:$8 sps:$4 sm:$0xff]  }
  0x9d   :  { %540 = vmatprep.subr.bf16.mxu0 %v2050_v6  ;;  %801 = vmatprep.subr.bf16.mxu1 %v2053_v7  ;;  %v2065_v6 = vld [vmem:[#allocation7 + $0x14] ss:$8 sps:$4 sm:$0xff]   ;;  %v2060_v7 = vld [vmem:[#allocation6 + $0x10] ss:$8 sps:$4 sm:$0xff]  }
  0xa0   :  { %541 = vmatpush1.bf16.msra.mxu0 %v2048_v8  ;;  %802 = vmatpush1.bf16.msra.mxu1 %v2051_v9  ;;  %v2063_v8 = vld [vmem:[#allocation7 + $0x10] ss:$8 sps:$4 sm:$0xff]   ;;  %v2068_v9 = vld [vmem:[#allocation6 + $0x24] ss:$8 sps:$4 sm:$0xff]  }
  0xa1   :  { %1034 = vmatprep.subr.bf16.mxu0 %v2056_v10  ;;  %1297 = vmatprep.subr.bf16.mxu1 %v2059_v11  ;;  %v2071_v10 = vld [vmem:[#allocation7 + $0x24] ss:$8 sps:$4 sm:$0xff]   ;;  %v2066_v11 = vld [vmem:[#allocation6 + $0x20] ss:$8 sps:$4 sm:$0xff]  }
 0x136   :  { %v222_v23 = vpop.f32.mrb[0].mxu0  ;;  %v263_v24 = vpop.f32.mrb[0].mxu1 }
 0x137   :  { %v223_v25 = vadd.f32 %v222_v23, %v127_v19  ;;  %v264_v26 = vadd.f32 %v263_v24, %v135_v20  ;;  %v224_v27 = vpop.f32.mrb[1].mxu0  ;;  %v265_v28 = vpop.f32.mrb[1].mxu1  ;;  %v2080_v19 = vld [vmem:[#allocation6 + $0x44] ss:$8 sps:$4 sm:$0xff]   ;;  %v2086_v23 = vld [vmem:[#allocation6 + $0x54] ss:$8 sps:$4 sm:$0xff]  }
 0x138   :  { %v225_v29 = vadd.f32 %v224_v27, %v131_v21  ;;  %v266_v30 = vadd.f32 %v265_v28, %v139_v22  ;;  %v226_v31 = vpop.f32.mrb[2].mxu0  ;;  %v267_v32 = vpop.f32.mrb[2].mxu1  ;;  %v2083_v20 = vld [vmem:[#allocation7 + $0x44] ss:$8 sps:$4 sm:$0xff]   ;;  %v2078_v21 = vld [vmem:[#allocation6 + $0x40] ss:$8 sps:$4 sm:$0xff]  }
 0x139   :  { %v274_v33 = vmin.f32 %v223_v25, 0.0  ;;  %v276_v34 = vmin.f32 %v264_v26, 0.0  ;;  %v227_v35 = vpop.f32.mrb[3].mxu0  ;;  %v268_v36 = vpop.f32.mrb[3].mxu1  ;;  %vm270_vm1 = vcmp.gt.f32.partialorder %v223_v25, 0.0  ;;  %vm272_vm2 = vcmp.gt.f32.partialorder %v264_v26, 0.0 }
 0x13a   :  { %v275_v37 = vmin.f32 %v225_v29, 0.0  ;;  %v277_v38 = vmin.f32 %v266_v30, 0.0  ;;  %vm271_vm3 = vcmp.gt.f32.partialorder %v225_v29, 0.0  ;;  %vm273_vm4 = vcmp.gt.f32.partialorder %v266_v30, 0.0  ;;  %v2081_v22 = vld [vmem:[#allocation7 + $0x40] ss:$8 sps:$4 sm:$0xff]  }
 0x13b   :  { %v278_v39 = vmul.f32 1.442695, %v274_v33  ;;  %v282_v40 = vmul.f32 1.442695, %v276_v34  ;;  %v2089_v24 = vld [vmem:[#allocation7 + $0x54] ss:$8 sps:$4 sm:$0xff]  }
 0x13c   :  { %v280_v41 = vmul.f32 1.442695, %v275_v37  ;;  %v284_v42 = vmul.f32 1.442695, %v277_v38  ;;  %v2092_v27 = vld [vmem:[#allocation6 + $0x64] ss:$8 sps:$4 sm:$0xff]  }
 0x13d   :  { %2182 = vpow2.f32 %v278_v39  ;;  %v2095_v28 = vld [vmem:[#allocation7 + $0x64] ss:$8 sps:$4 sm:$0xff]   ;;  %v2098_v31 = vld [vmem:[#allocation6 + $0x74] ss:$8 sps:$4 sm:$0xff]   ;;  %v2096_v33 = vld [vmem:[#allocation6 + $0x70] ss:$8 sps:$4 sm:$0xff]  }
 0x13e   :  { %2184 = vpow2.f32 %v282_v40  ;;  %v2101_v32 = vld [vmem:[#allocation7 + $0x74] ss:$8 sps:$4 sm:$0xff]   ;;  %v2099_v34 = vld [vmem:[#allocation7 + $0x70] ss:$8 sps:$4 sm:$0xff]   ;;  %v2104_v35 = vld [vmem:[#allocation6 + $0x84] ss:$8 sps:$4 sm:$0xff]  }
 0x13f   :  { %2186 = vpow2.f32 %v280_v41  ;;  %v2107_v36 = vld [vmem:[#allocation7 + $0x84] ss:$8 sps:$4 sm:$0xff]   ;;  %v2102_v37 = vld [vmem:[#allocation6 + $0x80] ss:$8 sps:$4 sm:$0xff]   ;;  %v2110_v39 = vld [vmem:[#allocation6 + $0x94] ss:$8 sps:$4 sm:$0xff]  }
 0x140   :  { %2188 = vpow2.f32 %v284_v42  ;;  %v2105_v38 = vld [vmem:[#allocation7 + $0x80] ss:$8 sps:$4 sm:$0xff]   ;;  %v2113_v40 = vld [vmem:[#allocation7 + $0x94] ss:$8 sps:$4 sm:$0xff]   ;;  %v2108_v41 = vld [vmem:[#allocation6 + $0x90] ss:$8 sps:$4 sm:$0xff]  }
 0x141   :  { %v2111_v42 = vld [vmem:[#allocation7 + $0x90] ss:$8 sps:$4 sm:$0xff]  }
 0x147   :  { %v2183_v43 = vpop.eup %2182 }
 0x148   :  { %v2185_v44 = vpop.eup %2184  ;;  %v1719_v45 = vadd.f32 -1.0, %v2183_v43  ;;  %v2116_v43 = vld [vmem:[#allocation6 + $0xa4] ss:$8 sps:$4 sm:$0xff]  }
 0x149   :  { %v2187_v46 = vpop.eup %2186  ;;  %v1721_v47 = vadd.f32 -1.0, %v2185_v44  ;;  %v2119_v44 = vld [vmem:[#allocation7 + $0xa4] ss:$8 sps:$4 sm:$0xff]  }
 0x14a   :  { %v2189_v48 = vpop.eup %2188  ;;  %v290_v49 = vmul.f32 1.6732632, %v1719_v45  ;;  %v1720_v50 = vadd.f32 -1.0, %v2187_v46  ;;  %v2114_v45 = vld [vmem:[#allocation6 + $0xa0] ss:$8 sps:$4 sm:$0xff]  }
 0x14b   :  { %v292_v51 = vmul.f32 1.6732632, %v1721_v47  ;;  %v1722_v52 = vadd.f32 -1.0, %v2189_v48  ;;  %v2117_v46 = vld [vmem:[#allocation7 + $0xa0] ss:$8 sps:$4 sm:$0xff]  }
 0x14c   :  { %v294_v53 = vsel %vm270_vm1, %v223_v25, %v290_v49  ;;  %v291_v54 = vmul.f32 1.6732632, %v1720_v50  ;;  %v2084_v25 = vld [vmem:[#allocation6 + $0x50] ss:$8 sps:$4 sm:$0xff]   ;;  %v2122_v47 = vld [vmem:[#allocation6 + $0xb4] ss:$8 sps:$4 sm:$0xff]  }
 0x14d   :  { %v296_v55 = vsel %vm272_vm2, %v264_v26, %v292_v51  ;;  %v293_v56 = vmul.f32 1.6732632, %v1722_v52  ;;  %v298_v57 = vmul.f32 1.050701, %v294_v53  ;;  %v2087_v26 = vld [vmem:[#allocation7 + $0x50] ss:$8 sps:$4 sm:$0xff]  }
 0x14e   :  { %v295_v58 = vsel %vm271_vm3, %v225_v29, %v291_v54  ;;  %v300_v59 = vmul.f32 1.050701, %v296_v55  ;;  %v2090_v29 = vld [vmem:[#allocation6 + $0x60] ss:$8 sps:$4 sm:$0xff]   ;;  %v2125_v48 = vld [vmem:[#allocation7 + $0xb4] ss:$8 sps:$4 sm:$0xff]  }
 0x14f   :  { %v299_v60 = vmul.f32 1.050701, %v295_v58  ;;  %v297_v61 = vsel %vm273_vm4, %v266_v30, %v293_v56  ;;  %v302_v1 = vpack.c.bf16 %v298_v57, %v298_v57  ;;  %v2093_v30 = vld [vmem:[#allocation7 + $0x60] ss:$8 sps:$4 sm:$0xff]   ;;  %v2120_v49 = vld [vmem:[#allocation6 + $0xb0] ss:$8 sps:$4 sm:$0xff]  }
 0x150   :  { %v301_v62 = vmul.f32 1.050701, %v297_v61  ;;  %v304_v5 = vpack.c.bf16 %v300_v59, %v300_v59  ;;  %v2123_v50 = vld [vmem:[#allocation7 + $0xb0] ss:$8 sps:$4 sm:$0xff]   ;;  %v2128_v51 = vld [vmem:[#allocation6 + $0xc4] ss:$8 sps:$4 sm:$0xff]  }
 0x151   :  { %v303_v63 = vpack.c.bf16 %v299_v60, %v299_v60  ;;  %v2131_v52 = vld [vmem:[#allocation7 + $0xc4] ss:$8 sps:$4 sm:$0xff]   ;;  %v2126_v53 = vld [vmem:[#allocation6 + $0xc0] ss:$8 sps:$4 sm:$0xff]   ;;  %v2134_v55 = vld [vmem:[#allocation6 + $0xd4] ss:$8 sps:$4 sm:$0xff]  }
 0x152   :  { %v305_v2 = vpack.c.bf16 %v301_v62, %v301_v62  ;;  %v2129_v54 = vld [vmem:[#allocation7 + $0xc0] ss:$8 sps:$4 sm:$0xff]   ;;  %v2137_v56 = vld [vmem:[#allocation7 + $0xd4] ss:$8 sps:$4 sm:$0xff]   ;;  %v2132_v57 = vld [vmem:[#allocation6 + $0xd0] ss:$8 sps:$4 sm:$0xff]  }
 0x153   :  { %542 = vmatprep.mubr.bf16.mxu0 %v303_v63  ;;  %v2135_v58 = vld [vmem:[#allocation7 + $0xd0] ss:$8 sps:$4 sm:$0xff]   ;;  %v2140_v59 = vld [vmem:[#allocation6 + $0xe4] ss:$8 sps:$4 sm:$0xff]   ;;  %v2138_v61 = vld [vmem:[#allocation6 + $0xe0] ss:$8 sps:$4 sm:$0xff]  }
 0x154   :  { %803 = vmatprep.mubr.bf16.mxu1 %v305_v2  ;;  %543 = vmatmul.mubr.bf16.vlgmr.msra.gmra.mrb[4].mxu0 %v302_v1  ;;  %v2143_v60 = vld [vmem:[#allocation7 + $0xe4] ss:$8 sps:$4 sm:$0xff]   ;;  %v2141_v62 = vld [vmem:[#allocation7 + $0xe0] ss:$8 sps:$4 sm:$0xff]   ;;  %v2146_v63 = vld [vmem:[#allocation6 + $0xf4] ss:$8 sps:$4 sm:$0xff]  }
 0x155   :  { %804 = vmatmul.mubr.bf16.vlgmr.msra.gmra.mrb[4].mxu1 %v304_v5  ;;  %1035 = vmatpush1.bf16.msra.mxu0 %v2054_v0  ;;  %v2149_v0 = vld [vmem:[#allocation7 + $0xf4] ss:$8 sps:$4 sm:$0xff]   ;;  %v2144_v1 = vld [vmem:[#allocation6 + $0xf0] ss:$8 sps:$4 sm:$0xff]   ;;  %v338_v5 = vld [vmem:[%s2554_s4] sm:$0x3] }
 0x156   :  { %1298 = vmatpush1.bf16.msra.mxu1 %v2057_v3  ;;  %1036 = vmatprep.subr.bf16.mxu0 %v2062_v4  ;;  %v2147_v2 = vld [vmem:[#allocation7 + $0xf0] ss:$8 sps:$4 sm:$0xff]   ;;  %v2150_v3 = vld [vmem:[#allocation9 + $0x40] sm:$0xff]  }
 0x157   :  { %1299 = vmatprep.subr.bf16.mxu1 %v2065_v6  ;;  %v2151_v4 = vld [vmem:[#allocation9 + $0xc0] sm:$0xff]  }
 0x158   :  { %v599_v6 = vld [vmem:[%s2556_s6] sm:$0x3] }
 0x159   :  { %1037 = vmatpush1.bf16.msra.mxu0 %v2060_v7  ;;  %v343_v7 = vrot.slane %v338_v5, %v2515_v14 }
 0x15a   :  { %1300 = vmatpush1.bf16.msra.mxu1 %v2063_v8  ;;  %1038 = vmatprep.subr.bf16.mxu0 %v2068_v9  ;;  %v604_v8 = vrot.slane %v599_v6, %v2515_v14  ;;  %v347_v9 = vrot.slane %v338_v5, %v2520_v17  ;;  %v2164_v5 = vld [vmem:[#allocation9 + $0x18] sm:$0xff]  }
 0x15b   :  { %1301 = vmatprep.subr.bf16.mxu1 %v2071_v10  ;;  %v608_v10 = vrot.slane %v599_v6, %v2520_v17  ;;  %v2165_v6 = vld [vmem:[#allocation9 + $0x98] sm:$0xff]  }
 0x15d   :  { %1039 = vmatpush1.bf16.msra.mxu0 %v2066_v11 }
 0x15e   :  { %1302 = vmatpush1.bf16.msra.mxu1 %v2069_v12  ;;  %1040 = vmatprep.subr.bf16.mxu0 %v2074_v13 }
 0x15f   :  { %1303 = vmatprep.subr.bf16.mxu1 %v2077_v15 }
 0x161   :  { %1041 = vmatpush1.bf16.msra.mxu0 %v2072_v16 }
 0x162   :  { %1304 = vmatpush1.bf16.msra.mxu1 %v2075_v18  ;;  %1042 = vmatprep.subr.bf16.mxu0 %v2080_v19 }
 0x163   :  { %1305 = vmatprep.subr.bf16.mxu1 %v2083_v20 }
 0x165   :  { %1043 = vmatpush1.bf16.msra.mxu0 %v2078_v21 }
 0x166   :  { %1306 = vmatpush1.bf16.msra.mxu1 %v2081_v22  ;;  %1044 = vmatprep.subr.bf16.mxu0 %v2086_v23 }
 0x167   :  { %1307 = vmatprep.subr.bf16.mxu1 %v2089_v24 }
 0x169   :  { %1045 = vmatpush1.bf16.msra.mxu0 %v2084_v25 }
 0x16a   :  { %1308 = vmatpush1.bf16.msra.mxu1 %v2087_v26  ;;  %1046 = vmatprep.subr.bf16.mxu0 %v2092_v27 }
 0x16b   :  { %1309 = vmatprep.subr.bf16.mxu1 %v2095_v28 }
 0x16d   :  { %1047 = vmatpush1.bf16.msra.mxu0 %v2090_v29 }
 0x16e   :  { %1310 = vmatpush1.bf16.msra.mxu1 %v2093_v30  ;;  %1048 = vmatprep.subr.bf16.mxu0 %v2098_v31 }
 0x16f   :  { %1311 = vmatprep.subr.bf16.mxu1 %v2101_v32 }
 0x171   :  { %1049 = vmatpush1.bf16.msra.mxu0 %v2096_v33 }
 0x172   :  { %1312 = vmatpush1.bf16.msra.mxu1 %v2099_v34  ;;  %1050 = vmatprep.subr.bf16.mxu0 %v2104_v35 }
 0x173   :  { %1313 = vmatprep.subr.bf16.mxu1 %v2107_v36 }
 0x175   :  { %1051 = vmatpush1.bf16.msra.mxu0 %v2102_v37 }
 0x176   :  { %1314 = vmatpush1.bf16.msra.mxu1 %v2105_v38  ;;  %1052 = vmatprep.subr.bf16.mxu0 %v2110_v39 }
 0x177   :  { %1315 = vmatprep.subr.bf16.mxu1 %v2113_v40 }
 0x179   :  { %1053 = vmatpush1.bf16.msra.mxu0 %v2108_v41 }
 0x17a   :  { %1316 = vmatpush1.bf16.msra.mxu1 %v2111_v42  ;;  %1054 = vmatprep.subr.bf16.mxu0 %v2116_v43 }
 0x17b   :  { %1317 = vmatprep.subr.bf16.mxu1 %v2119_v44 }
 0x17d   :  { %1055 = vmatpush1.bf16.msra.mxu0 %v2114_v45 }
 0x17e   :  { %1318 = vmatpush1.bf16.msra.mxu1 %v2117_v46  ;;  %1056 = vmatprep.subr.bf16.mxu0 %v2122_v47 }
 0x17f   :  { %1319 = vmatprep.subr.bf16.mxu1 %v2125_v48 }
 0x181   :  { %1057 = vmatpush1.bf16.msra.mxu0 %v2120_v49 }
 0x182   :  { %1320 = vmatpush1.bf16.msra.mxu1 %v2123_v50  ;;  %1058 = vmatprep.subr.bf16.mxu0 %v2128_v51 }
 0x183   :  { %1321 = vmatprep.subr.bf16.mxu1 %v2131_v52 }
 0x185   :  { %1059 = vmatpush1.bf16.msra.mxu0 %v2126_v53 }
 0x186   :  { %1322 = vmatpush1.bf16.msra.mxu1 %v2129_v54  ;;  %1060 = vmatprep.subr.bf16.mxu0 %v2134_v55  ;;  %v2152_v54 = vld [vmem:[#allocation9] sm:$0xff]  }
 0x187   :  { %1323 = vmatprep.subr.bf16.mxu1 %v2137_v56 }
 0x189   :  { %1061 = vmatpush1.bf16.msra.mxu0 %v2132_v57  ;;  %v2153_v57 = vld [vmem:[#allocation9 + $0x80] sm:$0xff]  }
 0x18a   :  { %1324 = vmatpush1.bf16.msra.mxu1 %v2135_v58  ;;  %1062 = vmatprep.subr.bf16.mxu0 %v2140_v59  ;;  %v2154_v59 = vld [vmem:[#allocation9 + $0x48] sm:$0xff]  }
 0x18b   :  { %1325 = vmatprep.subr.bf16.mxu1 %v2143_v60  ;;  %v2155_v60 = vld [vmem:[#allocation9 + $0xc8] sm:$0xff]  }
 0x18d   :  { %1063 = vmatpush1.bf16.msra.mxu0 %v2138_v61  ;;  %v2156_v61 = vld [vmem:[#allocation9 + $0x8] sm:$0xff]  }
 0x18e   :  { %1326 = vmatpush1.bf16.msra.mxu1 %v2141_v62  ;;  %1064 = vmatprep.subr.bf16.mxu0 %v2146_v63  ;;  %v2157_v62 = vld [vmem:[#allocation9 + $0x88] sm:$0xff]   ;;  %v2158_v63 = vld [vmem:[#allocation9 + $0x50] sm:$0xff]  }
 0x18f   :  { %1327 = vmatprep.subr.bf16.mxu1 %v2149_v0  ;;  %v2159_v0 = vld [vmem:[#allocation9 + $0xd0] sm:$0xff]  }
 0x191   :  { %1065 = vmatpush1.bf16.msra.mxu0 %v2144_v1  ;;  %v2160_v1 = vld [vmem:[#allocation9 + $0x10] sm:$0xff]  }
 0x192   :  { %1328 = vmatpush1.bf16.msra.mxu1 %v2147_v2  ;;  %1892 = vmatprep.subr.bf16.mxu0 %v2150_v3  ;;  %v2161_v2 = vld [vmem:[#allocation9 + $0x90] sm:$0xff]   ;;  %v2162_v3 = vld [vmem:[#allocation9 + $0x58] sm:$0xff]  }
 0x193   :  { %1914 = vmatprep.subr.bf16.mxu1 %v2151_v4  ;;  %v2163_v4 = vld [vmem:[#allocation9 + $0xd8] sm:$0xff]  }
 0x227   :  { %v544_v11 = vpop.f32.mrb[4].mxu0 }
 0x228   :  { %v545_v12 = vadd.f32 %v544_v11, %v343_v7  ;;  %v805_v13 = vpop.f32.mrb[4].mxu1  ;;  %v546_v15 = vpop.f32.mrb[5].mxu0  ;;  %v2166_v7 = vld [vmem:[#allocation9 + $0x60] sm:$0xff]   ;;  %v2170_v11 = vld [vmem:[#allocation9 + $0x68] sm:$0xff]  }
 0x229   :  { %v806_v16 = vadd.f32 %v805_v13, %v604_v8  ;;  %v547_v18 = vadd.f32 %v546_v15, %v347_v9  ;;  %v807_v19 = vpop.f32.mrb[5].mxu1  ;;  %v548_v20 = vpop.f32.mrb[6].mxu0  ;;  %v2167_v8 = vld [vmem:[#allocation9 + $0xe0] sm:$0xff]   ;;  %v2172_v13 = vld [vmem:[#allocation9 + $0x28] sm:$0xff]  }
 0x22a   :  { %v553_v21 = vmin.f32 %v545_v12, 0.0  ;;  %v808_v22 = vadd.f32 %v807_v19, %v608_v10  ;;  %v809_v23 = vpop.f32.mrb[6].mxu1  ;;  %v549_v24 = vpop.f32.mrb[7].mxu0  ;;  %vm551_vm5 = vcmp.gt.f32.partialorder %v545_v12, 0.0  ;;  %v2168_v9 = vld [vmem:[#allocation9 + $0x20] sm:$0xff]   ;;  %v2173_v15 = vld [vmem:[#allocation9 + $0xa8] sm:$0xff]  }
 0x22b   :  { %v814_v25 = vmin.f32 %v806_v16, 0.0  ;;  %v554_v26 = vmin.f32 %v547_v18, 0.0  ;;  %v810_v27 = vpop.f32.mrb[7].mxu1  ;;  %vm812_vm6 = vcmp.gt.f32.partialorder %v806_v16, 0.0  ;;  %vm552_vm7 = vcmp.gt.f32.partialorder %v547_v18, 0.0  ;;  %v2169_v10 = vld [vmem:[#allocation9 + $0xa0] sm:$0xff]  }
 0x22c   :  { %v555_v28 = vmul.f32 1.442695, %v553_v21  ;;  %v815_v29 = vmin.f32 %v808_v22, 0.0  ;;  %vm813_vm8 = vcmp.gt.f32.partialorder %v808_v22, 0.0  ;;  %v2176_v19 = vld [vmem:[#allocation9 + $0x30] sm:$0xff]   ;;  %v2178_v21 = vld [vmem:[#allocation9 + $0x78] sm:$0xff]  }
 0x22d   :  { %v816_v30 = vmul.f32 1.442695, %v814_v25  ;;  %v557_v31 = vmul.f32 1.442695, %v554_v26  ;;  %v2177_v20 = vld [vmem:[#allocation9 + $0xb0] sm:$0xff]   ;;  %v2180_v23 = vld [vmem:[#allocation9 + $0x38] sm:$0xff]  }
 0x22e   :  { %2190 = vpow2.f32 %v555_v28  ;;  %v818_v32 = vmul.f32 1.442695, %v815_v29  ;;  %v2181_v24 = vld [vmem:[#allocation9 + $0xb8] sm:$0xff]   ;;  %v862_v25 = vld [vmem:[%s2558_s8] sm:$0x3] }
 0x22f   :  { %2192 = vpow2.f32 %v816_v30  ;;  %v1125_v26 = vld [vmem:[%s2560_s10] sm:$0x3]  ;;  %v867_v27 = vrot.slane %v862_v25, %v2515_v14  ;;  %v871_v29 = vrot.slane %v862_v25, %v2520_v17 }
 0x230   :  { %2194 = vpow2.f32 %v557_v31  ;;  %v1130_v28 = vrot.slane %v1125_v26, %v2515_v14  ;;  %v1134_v30 = vrot.slane %v1125_v26, %v2520_v17 }
 0x231   :  { %2196 = vpow2.f32 %v818_v32 }
 0x238   :  { %v2191_v33 = vpop.eup %2190 }
 0x239   :  { %v2193_v34 = vpop.eup %2192  ;;  %v1755_v35 = vadd.f32 -1.0, %v2191_v33 }
 0x23a   :  { %v2195_v36 = vpop.eup %2194  ;;  %v1789_v37 = vadd.f32 -1.0, %v2193_v34 }
 0x23b   :  { %v2197_v38 = vpop.eup %2196  ;;  %v561_v39 = vmul.f32 1.6732632, %v1755_v35  ;;  %v1756_v40 = vadd.f32 -1.0, %v2195_v36 }
 0x23c   :  { %v822_v41 = vmul.f32 1.6732632, %v1789_v37  ;;  %v1790_v42 = vadd.f32 -1.0, %v2197_v38 }
 0x23d   :  { %v563_v43 = vsel %vm551_vm5, %v545_v12, %v561_v39  ;;  %v562_v44 = vmul.f32 1.6732632, %v1756_v40  ;;  %v2171_v12 = vld [vmem:[#allocation9 + $0xe8] sm:$0xff]  }
 0x23e   :  { %v824_v45 = vsel %vm812_vm6, %v806_v16, %v822_v41  ;;  %v823_v46 = vmul.f32 1.6732632, %v1790_v42  ;;  %v565_v47 = vmul.f32 1.050701, %v563_v43  ;;  %v2174_v16 = vld [vmem:[#allocation9 + $0x70] sm:$0xff]  }
 0x23f   :  { %v564_v48 = vsel %vm552_vm7, %v547_v18, %v562_v44  ;;  %v826_v49 = vmul.f32 1.050701, %v824_v45  ;;  %v2175_v18 = vld [vmem:[#allocation9 + $0xf0] sm:$0xff]  }
 0x240   :  { %v566_v50 = vmul.f32 1.050701, %v564_v48  ;;  %v825_v51 = vsel %vm813_vm8, %v808_v22, %v823_v46  ;;  %v828_v55 = vpack.c.bf16 %v565_v47, %v565_v47  ;;  %v2179_v22 = vld [vmem:[#allocation9 + $0xf8] sm:$0xff]  }
 0x241   :  { %v827_v52 = vmul.f32 1.050701, %v825_v51  ;;  %v1091_v58 = vpack.c.bf16 %v826_v49, %v826_v49 }
 0x242   :  { %v829_v53 = vpack.c.bf16 %v566_v50, %v566_v50 }
 0x243   :  { %v1092_v56 = vpack.c.bf16 %v827_v52, %v827_v52 }
 0x244   :  { %1066 = vmatprep.mubr.bf16.mxu0 %v829_v53 }
 0x245   :  { %1329 = vmatprep.mubr.bf16.mxu1 %v1092_v56  ;;  %1067 = vmatmul.mubr.bf16.vlgmr.msra.gmra.mrb[8].mxu0 %v828_v55 }
 0x246   :  { %1330 = vmatmul.mubr.bf16.vlgmr.msra.gmra.mrb[8].mxu1 %v1091_v58  ;;  %1893 = vmatpush3.bf16.msra.mxu0 %v2152_v54 }
 0x247   :  { %1915 = vmatpush3.bf16.msra.mxu1 %v2153_v57  ;;  %1894 = vmatprep.subr.bf16.mxu0 %v2154_v59 }
 0x248   :  { %1916 = vmatprep.subr.bf16.mxu1 %v2155_v60 }
 0x24a   :  { %1895 = vmatpush3.bf16.msra.mxu0 %v2156_v61 }
 0x24b   :  { %1917 = vmatpush3.bf16.msra.mxu1 %v2157_v62  ;;  %1896 = vmatprep.subr.bf16.mxu0 %v2158_v63 }
 0x24c   :  { %1918 = vmatprep.subr.bf16.mxu1 %v2159_v0 }
 0x24e   :  { %1897 = vmatpush3.bf16.msra.mxu0 %v2160_v1 }
 0x24f   :  { %1919 = vmatpush3.bf16.msra.mxu1 %v2161_v2  ;;  %1898 = vmatprep.subr.bf16.mxu0 %v2162_v3 }
 0x250   :  { %1920 = vmatprep.subr.bf16.mxu1 %v2163_v4 }
 0x252   :  { %1899 = vmatpush3.bf16.msra.mxu0 %v2164_v5 }
 0x253   :  { %1921 = vmatpush3.bf16.msra.mxu1 %v2165_v6  ;;  %1900 = vmatprep.subr.bf16.mxu0 %v2166_v7 }
 0x254   :  { %1922 = vmatprep.subr.bf16.mxu1 %v2167_v8 }
 0x256   :  { %1901 = vmatpush3.bf16.msra.mxu0 %v2168_v9 }
 0x257   :  { %1923 = vmatpush3.bf16.msra.mxu1 %v2169_v10  ;;  %1902 = vmatprep.subr.bf16.mxu0 %v2170_v11  ;;  %v1859_v11 = vld [vmem:[%s2562_s12] ss:$0 sm:$0xff] }
 0x258   :  { %1924 = vmatprep.subr.bf16.mxu1 %v2171_v12 }
 0x25a   :  { %1903 = vmatpush3.bf16.msra.mxu0 %v2172_v13 }
 0x25b   :  { %1925 = vmatpush3.bf16.msra.mxu1 %v2173_v15  ;;  %1904 = vmatprep.subr.bf16.mxu0 %v2174_v16 }
 0x25c   :  { %1926 = vmatprep.subr.bf16.mxu1 %v2175_v18 }
 0x25e   :  { %1905 = vmatpush3.bf16.msra.mxu0 %v2176_v19 }
 0x25f   :  { %1927 = vmatpush3.bf16.msra.mxu1 %v2177_v20  ;;  %1906 = vmatprep.subr.bf16.mxu0 %v2178_v21 }
 0x260   :  { %1928 = vmatprep.subr.bf16.mxu1 %v2179_v22 }
 0x262   :  { %1907 = vmatpush3.bf16.msra.mxu0 %v2180_v23 }
 0x263   :  { %1929 = vmatpush3.bf16.msra.mxu1 %v2181_v24 }
 0x318   :  { %v1068_v31 = vpop.f32.mrb[8].mxu0 }
 0x319   :  { %v1069_v32 = vadd.f32 %v1068_v31, %v867_v27  ;;  %v1331_v33 = vpop.f32.mrb[8].mxu1  ;;  %v1070_v34 = vpop.f32.mrb[9].mxu0 }
 0x31a   :  { %v1332_v35 = vadd.f32 %v1331_v33, %v1130_v28  ;;  %v1071_v36 = vadd.f32 %v1070_v34, %v871_v29  ;;  %v1333_v37 = vpop.f32.mrb[9].mxu1  ;;  %v1072_v38 = vpop.f32.mrb[10].mxu0 }
 0x31b   :  { %v1077_v39 = vmin.f32 %v1069_v32, 0.0  ;;  %v1334_v40 = vadd.f32 %v1333_v37, %v1134_v30  ;;  %v1335_v41 = vpop.f32.mrb[10].mxu1  ;;  %v1073_v42 = vpop.f32.mrb[11].mxu0  ;;  %vm1075_vm9 = vcmp.gt.f32.partialorder %v1069_v32, 0.0 }
 0x31c   :  { %v1340_v43 = vmin.f32 %v1332_v35, 0.0  ;;  %v1078_v44 = vmin.f32 %v1071_v36, 0.0  ;;  %v1336_v45 = vpop.f32.mrb[11].mxu1  ;;  %vm1338_vm10 = vcmp.gt.f32.partialorder %v1332_v35, 0.0  ;;  %vm1076_vm11 = vcmp.gt.f32.partialorder %v1071_v36, 0.0 }
 0x31d   :  { %v1079_v14 = vmul.f32 1.442695, %v1077_v39  ;;  %v1341_v46 = vmin.f32 %v1334_v40, 0.0  ;;  %vm1339_vm12 = vcmp.gt.f32.partialorder %v1334_v40, 0.0 }
 0x31e   :  { %v1342_v47 = vmul.f32 1.442695, %v1340_v43  ;;  %v1081_v48 = vmul.f32 1.442695, %v1078_v44 }
 0x31f   :  { %2198 = vpow2.f32 %v1079_v14  ;;  %v1344_v17 = vmul.f32 1.442695, %v1341_v46 }
 0x320   :  { %2200 = vpow2.f32 %v1342_v47 }
 0x321   :  { %2202 = vpow2.f32 %v1081_v48 }
 0x322   :  { %2204 = vpow2.f32 %v1344_v17 }
 0x329   :  { %v2199_v49 = vpop.eup %2198 }
 0x32a   :  { %v2201_v50 = vpop.eup %2200  ;;  %v1823_v51 = vadd.f32 -1.0, %v2199_v49 }
 0x32b   :  { %v2203_v52 = vpop.eup %2202  ;;  %v1857_v53 = vadd.f32 -1.0, %v2201_v50 }
 0x32c   :  { %v2205_v54 = vpop.eup %2204  ;;  %v1085_v55 = vmul.f32 1.6732632, %v1823_v51  ;;  %v1824_v56 = vadd.f32 -1.0, %v2203_v52 }
 0x32d   :  { %v1348_v57 = vmul.f32 1.6732632, %v1857_v53  ;;  %v1858_v58 = vadd.f32 -1.0, %v2205_v54 }
 0x32e   :  { %v1087_v59 = vsel %vm1075_vm9, %v1069_v32, %v1085_v55  ;;  %v1086_v60 = vmul.f32 1.6732632, %v1824_v56 }
 0x32f   :  { %v1350_v61 = vsel %vm1338_vm10, %v1332_v35, %v1348_v57  ;;  %v1349_v62 = vmul.f32 1.6732632, %v1858_v58  ;;  %v1089_v63 = vmul.f32 1.050701, %v1087_v59 }
 0x330   :  { %v1088_v0 = vsel %vm1076_vm11, %v1071_v36, %v1086_v60  ;;  %v1352_v1 = vmul.f32 1.050701, %v1350_v61 }
 0x331   :  { %v1090_v2 = vmul.f32 1.050701, %v1088_v0  ;;  %v1351_v3 = vsel %vm1339_vm12, %v1334_v40, %v1349_v62  ;;  %v1354_v6 = vpack.c.bf16 %v1089_v63, %v1089_v63 }
 0x332   :  { %v1353_v4 = vmul.f32 1.050701, %v1351_v3  ;;  %v1356_v8 = vpack.c.bf16 %v1352_v1, %v1352_v1 }
 0x333   :  { %v1355_v5 = vpack.c.bf16 %v1090_v2, %v1090_v2 }
 0x334   :  { %v1357_v7 = vpack.c.bf16 %v1353_v4, %v1353_v4 }
 0x335   :  { %1653 = vmatprep.mubr.bf16.mxu0 %v1355_v5 }
 0x336   :  { %1693 = vmatprep.mubr.bf16.mxu1 %v1357_v7  ;;  %1654 = vmatmul.mubr.bf16.vlgmr.msra.gmra.mrb[12].mxu0 %v1354_v6 }
 0x337   :  { %1694 = vmatmul.mubr.bf16.vlgmr.msra.gmra.mrb[12].mxu1 %v1356_v8 }
 0x409   :  { %v1908_v9 = vpop.f32.mrb[12].mxu0 }
 0x40a   :  { %v1930_v10 = vpop.f32.mrb[12].mxu1  ;;  %v1909_v12 = vpop.f32.mrb[13].mxu0 }
 0x40b   :  { %v1910_v13 = vadd.f32 %v1909_v12, %v1908_v9  ;;  %v1931_v15 = vpop.f32.mrb[13].mxu1  ;;  %v1911_v16 = vpop.f32.mrb[14].mxu0 }
 0x40c   :  { %v1932_v18 = vadd.f32 %v1931_v15, %v1930_v10  ;;  %v1933_v19 = vpop.f32.mrb[14].mxu1  ;;  %v1912_v20 = vpop.f32.mrb[15].mxu0 }
 0x40d   :  { %v1656_v21 = vadd.f32 %v1910_v13, %v1859_v11  ;;  %v1934_v22 = vpop.f32.mrb[15].mxu1 }
 0x40f   :  { %v1696_v23 = vadd.f32 %v1932_v18, %v1656_v21 }
 0x411   :  { %1701 = vst [vmem:[%s2563_s13] sm:$0xff] %v1696_v23 }
 0x412   :  { %1706 = vsyncpa [#allocation3], 1 }
 0x413   :  { %1707 = vsyncpa [#allocation5], 1 }
 0x414   :  { %1708 = vsyncpa [#allocation8], 1 }

</bundles_post_ra>
